<compile_context>
chip_gen: v7x
topology: tpu7x:2x2x1
jax: 0.10.0
libtpu: 0.0.40
codegen_flags: <defaults>
</compile_context>

<pallas_src>
import jax
import jax.numpy as jnp
from jax.experimental import pallas as pl
from jax.experimental.pallas import tpu as pltpu

MINIMUM_SCALE = 1e-10
SCALING_DIM = 1      # sequence axis
KEEPDIM = True

_SMALL_INPUT_BYTES = 1 << 20   # below this, a single fused XLA path beats 2 Pallas dispatches
_MAX_FOLDED_LANES = 2048       # cap on the folded (lane) channel width


# ----------------------------------------------------------- HW-aware sizing
def _tpu_vmem_bytes():
    try:
        info = pltpu.get_tpu_info()
        v = int(getattr(info, "vmem_capacity_bytes", 0) or 0)
        if v > 0:
            return v
    except Exception:
        pass
    return 64 << 20   # conservative fallback: v7x per-TC physical VMEM


def _vmem_budgets():
    vmem = _tpu_vmem_bytes()
    # Never ask for more than ~3/4 of physical VMEM (v7x: 48 MiB, v5e/v6e: 96 MiB).
    vmem_limit = min((vmem * 3) // 4, 96 << 20)
    # Pass-2 footprint ~= 4 * block_bytes (double-buffered input + output);
    # keep it well under the limit.  v6e: 8 MiB blocks, v7x: 6 MiB, fallback: 6 MiB.
    block_budget = max(1 << 20, min(8 << 20, vmem_limit // 8))
    return block_budget, vmem_limit


def _pick_fold(sl, c):
    """k | SL so the folded lane dim k*C is dense (prefer a multiple of 128)."""
    if c >= 128:
        return 1
    best = 1
    for k in range(1, min(sl, max(_MAX_FOLDED_LANES // max(c, 1), 1)) + 1):
        if sl % k:
            continue
        if (k * c) % 128 == 0:
            return k                       # smallest k giving a 128-multiple lane width
        if k * c <= 1024:
            best = k                       # otherwise: widest reasonable lane width
    return best


def _pick_sl_tile(sl_f, row_bytes, block_budget):
    """Largest multiple-of-32 SL tile under the budget (never the whole axis if it
    exceeds the budget).  32, not 8: bool/int8 masks use a (32,128) packed tile."""
    if sl_f * row_bytes <= block_budget:
        return sl_f
    ts = (block_budget // row_bytes) // 32 * 32
    return max(32, ts)


# ---------------------------------------------------------------- kernel 1 --
def _make_reduce_kernel(sl_total, ts, needs_mask):
    def kernel(data_ref, mask_ref, ts_sum_ref, num_obs_ref):
        # data_ref: (1, ts, Cf) data dtype; mask_ref: (1, ts, Cf) bool.
        # Output blocks (1, 1, Cf) are resident across the SL grid axis.
        @pl.when(pl.program_id(1) == 0)
        def _():
            ts_sum_ref[...] = jnp.zeros_like(ts_sum_ref)
            num_obs_ref[...] = jnp.zeros_like(num_obs_ref)

        m = mask_ref[...]
        d = data_ref[...].astype(jnp.float32)
        if needs_mask:
            # Tail tile: rows >= sl_total come from padded (undefined) reads.
            row = (pl.program_id(1) * ts
                   + jax.lax.broadcasted_iota(jnp.int32, d.shape, 1))
            valid = row < sl_total
            m = jnp.logical_and(m, valid)
            d = jnp.where(valid, d, 0.0)
        # Decoupled VALU chains: abs-sum uses the bool mask directly (select),
        # the f32 cast feeds only the count accumulator.
        ts_sum_ref[...] += jnp.sum(jnp.where(m, jnp.abs(d), 0.0),
                                   axis=1, keepdims=True)
        num_obs_ref[...] += jnp.sum(m.astype(jnp.float32), axis=1, keepdims=True)
    return kernel


# ---------------------------------------------------------------- kernel 2 --
def _scale_kernel(data_ref, inv_ref, scaled_ref):
    # data_ref: (1, ts, Cf); inv_ref: (1, 1, Cf) f32 -> broadcast multiply.
    scaled_ref[...] = (data_ref[...] * inv_ref[...]).astype(scaled_ref.dtype)


# ------------------------------------------------------------- jnp fallback --
def _jnp_fallback(data, observed_mask):
    mask = observed_mask.astype(data.dtype)
    ts_sum = jnp.abs(data * mask).sum(SCALING_DIM, keepdims=True)
    num_observed = mask.sum(SCALING_DIM, keepdims=True)
    scale = ts_sum / jnp.maximum(num_observed, 1.0)
    batch_sum = ts_sum.sum(axis=0)
    batch_obs = jnp.maximum(num_observed.sum(axis=0), 1.0)
    scale = jnp.where(num_observed > 0, scale, batch_sum / batch_obs)
    scale = jnp.maximum(scale, MINIMUM_SCALE)
    scaled = data / scale
    loc = jnp.zeros_like(scale)
    if not KEEPDIM:
        loc = jnp.squeeze(loc, SCALING_DIM)
        scale = jnp.squeeze(scale, SCALING_DIM)
    return scaled, loc, scale


# ----------------------------------------------------------------- wrapper --
def ttm_mean_scaler(data, observed_mask, *, force_pallas=False, sl_tile=None):
    """data: [B, SL, C] float, observed_mask: [B, SL, C] bool.

    Returns (scaled_data [B,SL,C], loc [B,1,C] zeros, scale [B,1,C]).
    """
    B, SL, C = data.shape
    nbytes = data.size * data.dtype.itemsize
    if (not force_pallas) and nbytes < _SMALL_INPUT_BYTES:
        # Two Pallas dispatches + glue overhead dominates tiny inputs.
        return _jnp_fallback(data, observed_mask)

    mask_bool = observed_mask.astype(jnp.bool_)
    block_budget, vmem_limit = _vmem_budgets()

    # ---- lane-dense folding: [B, SL, C] -> [B, SL/k, k*C] (layout no-op) ----
    k = _pick_fold(SL, C)
    SLf, Cf = SL // k, k * C
    data_f = data.reshape(B, SLf, Cf)
    mask_f = mask_bool.reshape(B, SLf, Cf)

    row_bytes = Cf * data.dtype.itemsize
    ts = sl_tile if sl_tile is not None else _pick_sl_tile(SLf, row_bytes, block_budget)
    n_sl = pl.cdiv(SLf, ts)
    needs_mask = (n_sl * ts) != SLf

    # ---- pass 1: per-batch reduction over the (folded) SL axis ----
    mask_nbytes = mask_f.size * mask_f.dtype.itemsize
    ts_sum_f, num_obs_f = pl.pallas_call(
        _make_reduce_kernel(SLf, ts, needs_mask),
        out_shape=(jax.ShapeDtypeStruct((B, 1, Cf), jnp.float32),
                   jax.ShapeDtypeStruct((B, 1, Cf), jnp.float32)),
        grid_spec=pltpu.PrefetchScalarGridSpec(
            num_scalar_prefetch=0,
            grid=(B, n_sl),
            in_specs=[pl.BlockSpec((1, ts, Cf), lambda b, s: (b, s, 0)),
                      pl.BlockSpec((1, ts, Cf), lambda b, s: (b, s, 0))],
            out_specs=[pl.BlockSpec((1, 1, Cf), lambda b, s: (b, 0, 0)),
                       pl.BlockSpec((1, 1, Cf), lambda b, s: (b, 0, 0))],
        ),
        compiler_params=pltpu.CompilerParams(
            dimension_semantics=("parallel", "arbitrary"),   # SL = reduction axis, last
            vmem_limit_bytes=vmem_limit),
        cost_estimate=pl.CostEstimate(
            flops=4 * data.size, transcendentals=0,
            bytes_accessed=nbytes + mask_nbytes + 8 * B * Cf),
    )(data_f, mask_f)

    # ---- glue: fold partials back to (B,1,C) and do the tiny scale math ----
    ts_sum = ts_sum_f.reshape(B, 1, k, C).sum(axis=2)
    num_obs = num_obs_f.reshape(B, 1, k, C).sum(axis=2)

    scale = ts_sum / jnp.maximum(num_obs, 1.0)
    batch_sum = jnp.sum(ts_sum, axis=0)                       # (1, C)
    batch_obs = jnp.maximum(jnp.sum(num_obs, axis=0), 1.0)    # (1, C)
    scale = jnp.where(num_obs > 0, scale, batch_sum / batch_obs)
    scale = jnp.maximum(scale, MINIMUM_SCALE)
    inv_scale = (1.0 / scale).astype(jnp.float32)   # exact: scale can be ~1e-10

    inv_f = jnp.tile(inv_scale, (1, 1, k))          # (B, 1, Cf): folded channel j -> j % C

    # ---- pass 2: fully parallel stream  scaled = data * inv_scale ----
    scaled_f = pl.pallas_call(
        _scale_kernel,
        out_shape=jax.ShapeDtypeStruct((B, SLf, Cf), data.dtype),
        grid_spec=pltpu.PrefetchScalarGridSpec(
            num_scalar_prefetch=0,
            grid=(B, n_sl),
            in_specs=[pl.BlockSpec((1, ts, Cf), lambda b, s: (b, s, 0)),
                      pl.BlockSpec((1, 1, Cf), lambda b, s: (b, 0, 0))],
            out_specs=pl.BlockSpec((1, ts, Cf), lambda b, s: (b, s, 0)),
        ),
        compiler_params=pltpu.CompilerParams(
            dimension_semantics=("parallel", "parallel"),     # no carried state
            vmem_limit_bytes=vmem_limit),
        cost_estimate=pl.CostEstimate(
            flops=data.size, transcendentals=0,
            bytes_accessed=2 * nbytes + 4 * B * Cf),
    )(data_f, inv_f)

    scaled = scaled_f.reshape(B, SL, C)
    scale = scale.astype(data.dtype)
    loc = jnp.zeros_like(scale)
    if not KEEPDIM:
        loc = jnp.squeeze(loc, axis=SCALING_DIM)
        scale = jnp.squeeze(scale, axis=SCALING_DIM)
    return scaled, loc, scale


# -------------------------------------------------------------------- tests --
def _check(out, ref):
    for a, b in zip(out, ref):
        assert a.shape == b.shape, (a.shape, b.shape)
        assert jnp.allclose(a, b, rtol=1e-5, atol=1e-5), float(jnp.max(jnp.abs(a - b)))


if __name__ == "__main__":
    k1, k2, k3, k4, k5, k6 = jax.random.split(jax.random.PRNGKey(0), 6)

    # Case A: tiny input -> fused jnp fallback path (shape/semantics check).
    dA = jax.random.normal(k1, (2, 16, 8), dtype=jnp.float32)
    mA = jax.random.bernoulli(k2, p=0.7, shape=(2, 16, 8))
    outA = jax.block_until_ready(ttm_mean_scaler(dA, mA))
    _check(outA, _jnp_fallback(dA, mA))
    assert outA[0].shape == (2, 16, 8) and outA[2].shape == (2, 1, 8)
    assert jnp.all(outA[1] == 0)

    # Case B: Pallas path with lane folding (C=8 -> k=16 -> Cf=128), a non-divisible
    # SL tail (SLf=40, tile 32) and a fully-unobserved (batch, channel) column
    # (exercises the default_scale path).
    dB = jax.random.normal(k3, (2, 640, 8), dtype=jnp.float32)
    mB = jax.random.bernoulli(k4, p=0.7, shape=(2, 640, 8))
    mB = mB.at[0, :, 3].set(False)
    outB = jax.block_until_ready(
        ttm_mean_scaler(dB, mB, force_pallas=True, sl_tile=32))
    _check(outB, _jnp_fallback(dB, mB))

    # Case C: Pallas path with C >= 128 (no folding) and SL=70 with tile 32
    # (tail masking only).
    dC = jax.random.normal(k5, (2, 70, 128), dtype=jnp.float32)
    mC = jax.random.bernoulli(k6, p=0.6, shape=(2, 70, 128))
    outC = jax.block_until_ready(
        ttm_mean_scaler(dC, mC, force_pallas=True, sl_tile=32))
    _check(outC, _jnp_fallback(dC, mC))

    print("KERNEL_OK")
</pallas_src>

<mosaic_0001>
module attributes {stable_mosaic.version = 11 : i64} {
  func.func @kernel(%arg0: i32, %arg1: i32, %arg2: memref<1x32x128xf32, #tpu.memory_space<vmem>>, %arg3: memref<1x32x128xi32, #tpu.memory_space<vmem>>, %arg4: memref<1x1x128xf32, #tpu.memory_space<vmem>>, %arg5: memref<1x1x128xf32, #tpu.memory_space<vmem>>) attributes {dimension_semantics = [#tpu.dimension_semantics<parallel>, #tpu.dimension_semantics<arbitrary>], iteration_bounds = array<i64: 2, 2>, scalar_prefetch = 0 : i64, scratch_operands = 0 : i64, tpu.core_type = #tpu.core_type<tc>, window_params = [{transform_indices = @transform_0, window_bounds = array<i64: 1, 32, 128>}, {transform_indices = @transform_1, window_bounds = array<i64: 1, 32, 128>}, {transform_indices = @transform_2, window_bounds = array<i64: 1, 1, 128>}, {transform_indices = @transform_3, window_bounds = array<i64: 1, 1, 128>}]} {
    %c0_i32 = arith.constant 0 : i32
    %0 = arith.cmpi eq, %arg1, %c0_i32 : i32
    %1 = arith.extui %0 : i1 to i32
    %c0_i32_0 = arith.constant 0 : i32
    %2 = arith.cmpi ne, %1, %c0_i32_0 : i32
    scf.if %2 {
      %cst_22 = arith.constant 0.000000e+00 : f32
      %30 = vector.broadcast %cst_22 : f32 to vector<1x1x128xf32>
      %c0_23 = arith.constant 0 : index
      %c0_24 = arith.constant 0 : index
      %c0_25 = arith.constant 0 : index
      %31 = vector.load %arg4[%c0_23, %c0_24, %c0_25] : memref<1x1x128xf32, #tpu.memory_space<vmem>>, vector<1x1x128xf32>
      tpu.vector_store %arg4[%c0_23, %c0_24, %c0_25], %30 {strides = array<i32>} : memref<1x1x128xf32, #tpu.memory_space<vmem>>, vector<1x1x128xf32>,
      %cst_26 = arith.constant 0.000000e+00 : f32
      %32 = vector.broadcast %cst_26 : f32 to vector<1x1x128xf32>
      %c0_27 = arith.constant 0 : index
      %c0_28 = arith.constant 0 : index
      %c0_29 = arith.constant 0 : index
      %33 = vector.load %arg5[%c0_27, %c0_28, %c0_29] : memref<1x1x128xf32, #tpu.memory_space<vmem>>, vector<1x1x128xf32>
      tpu.vector_store %arg5[%c0_27, %c0_28, %c0_29], %32 {strides = array<i32>} : memref<1x1x128xf32, #tpu.memory_space<vmem>>, vector<1x1x128xf32>,
    } else {
    }
    %c0 = arith.constant 0 : index
    %c0_1 = arith.constant 0 : index
    %c0_2 = arith.constant 0 : index
    %3 = vector.load %arg3[%c0, %c0_1, %c0_2] : memref<1x32x128xi32, #tpu.memory_space<vmem>>, vector<1x32x128xi32>
    %cst = arith.constant dense<0> : vector<1x32x128xi32>
    %4 = arith.cmpi ne, %3, %cst : vector<1x32x128xi32>
    %c0_3 = arith.constant 0 : index
    %c0_4 = arith.constant 0 : index
    %c0_5 = arith.constant 0 : index
    %5 = vector.load %arg2[%c0_3, %c0_4, %c0_5] : memref<1x32x128xf32, #tpu.memory_space<vmem>>, vector<1x32x128xf32>
    %c32_i32 = arith.constant 32 : i32
    %6 = arith.muli %arg1, %c32_i32 : i32
    %7 = tpu.iota {dimensions = array<i32: 1>} : vector<1x32x128xi32>
    %8 = vector.broadcast %6 : i32 to vector<1x32x128xi32>
    %9 = arith.addi %8, %7 : vector<1x32x128xi32>
    %c40_i32 = arith.constant 40 : i32
    %10 = vector.broadcast %c40_i32 : i32 to vector<1x32x128xi32>
    %11 = arith.cmpi slt, %9, %10 : vector<1x32x128xi32>
    %12 = arith.andi %4, %11 : vector<1x32x128xi1>
    %cst_6 = arith.constant 0.000000e+00 : f32
    %13 = vector.broadcast %cst_6 : f32 to vector<1x32x128xf32>
    %14 = arith.select %11, %5, %13 : vector<1x32x128xi1>, vector<1x32x128xf32>
    %c0_7 = arith.constant 0 : index
    %c0_8 = arith.constant 0 : index
    %c0_9 = arith.constant 0 : index
    %15 = vector.load %arg4[%c0_7, %c0_8, %c0_9] : memref<1x1x128xf32, #tpu.memory_space<vmem>>, vector<1x1x128xf32>
    %16 = math.absf %14 : vector<1x32x128xf32>
    %cst_10 = arith.constant 0.000000e+00 : f32
    %17 = vector.broadcast %cst_10 : f32 to vector<1x32x128xf32>
    %18 = arith.select %12, %16, %17 : vector<1x32x128xi1>, vector<1x32x128xf32>
    %cst_11 = arith.constant dense<0.000000e+00> : vector<1x128xf32>
    %19 = vector.multi_reduction <add>, %18, %cst_11 [1] : vector<1x32x128xf32> to vector<1x128xf32>
    %20 = vector.shape_cast %19 : vector<1x128xf32> to vector<1x1x128xf32>
    %21 = arith.addf %15, %20 : vector<1x1x128xf32>
    %c0_12 = arith.constant 0 : index
    %c0_13 = arith.constant 0 : index
    %c0_14 = arith.constant 0 : index
    %22 = vector.load %arg4[%c0_12, %c0_13, %c0_14] : memref<1x1x128xf32, #tpu.memory_space<vmem>>, vector<1x1x128xf32>
    tpu.vector_store %arg4[%c0_12, %c0_13, %c0_14], %21 {strides = array<i32>} : memref<1x1x128xf32, #tpu.memory_space<vmem>>, vector<1x1x128xf32>,
    %c0_15 = arith.constant 0 : index
    %c0_16 = arith.constant 0 : index
    %c0_17 = arith.constant 0 : index
    %23 = vector.load %arg5[%c0_15, %c0_16, %c0_17] : memref<1x1x128xf32, #tpu.memory_space<vmem>>, vector<1x1x128xf32>
    %24 = arith.extui %12 : vector<1x32x128xi1> to vector<1x32x128xi32>
    %25 = arith.sitofp %24 : vector<1x32x128xi32> to vector<1x32x128xf32>
    %cst_18 = arith.constant dense<0.000000e+00> : vector<1x128xf32>
    %26 = vector.multi_reduction <add>, %25, %cst_18 [1] : vector<1x32x128xf32> to vector<1x128xf32>
    %27 = vector.shape_cast %26 : vector<1x128xf32> to vector<1x1x128xf32>
    %28 = arith.addf %23, %27 : vector<1x1x128xf32>
    %c0_19 = arith.constant 0 : index
    %c0_20 = arith.constant 0 : index
    %c0_21 = arith.constant 0 : index
    %29 = vector.load %arg5[%c0_19, %c0_20, %c0_21] : memref<1x1x128xf32, #tpu.memory_space<vmem>>, vector<1x1x128xf32>
    tpu.vector_store %arg5[%c0_19, %c0_20, %c0_21], %28 {strides = array<i32>} : memref<1x1x128xf32, #tpu.memory_space<vmem>>, vector<1x1x128xf32>,
    return
  }
  func.func @transform_0(%arg0: i32, %arg1: i32) -> (i32, i32, i32) {
    %c0_i32 = arith.constant 0 : i32
    %c0_i32_0 = arith.constant 0 : i32
    return %arg0, %arg1, %c0_i32 : i32, i32, i32
  }
  func.func @transform_1(%arg0: i32, %arg1: i32) -> (i32, i32, i32) {
    %c0_i32 = arith.constant 0 : i32
    %c0_i32_0 = arith.constant 0 : i32
    return %arg0, %arg1, %c0_i32 : i32, i32, i32
  }
  func.func @transform_2(%arg0: i32, %arg1: i32) -> (i32, i32, i32) {
    %c0_i32 = arith.constant 0 : i32
    %c0_i32_0 = arith.constant 0 : i32
    %c0_i32_1 = arith.constant 0 : i32
    return %arg0, %c0_i32, %c0_i32_0 : i32, i32, i32
  }
  func.func @transform_3(%arg0: i32, %arg1: i32) -> (i32, i32, i32) {
    %c0_i32 = arith.constant 0 : i32
    %c0_i32_0 = arith.constant 0 : i32
    %c0_i32_1 = arith.constant 0 : i32
    return %arg0, %c0_i32, %c0_i32_0 : i32, i32, i32
  }
}

</mosaic_0001>

<bundles_post_ra>
// kernel: tpu_custom_call.1
= control target key start
LH: loop header
LB: loop body
LE: loop exit
PB: predicated region body
PF: predicated region fallthrough
CT: control target
= control target key end

     0   :  { %9 = vsyncpa [#allocation3], 0  ;;  %s956_s0 = inlined_call_operand.vmem [shape: f32[2,40,128], index: 0, kind: input, shape index: {}]   ;;  %s957_s1 = inlined_call_operand.vmem [shape: s32[2,40,128], index: 1, kind: input, shape index: {}]   ;;  %s958_s2 = inlined_call_operand.hbm [shape: f32[2,1,128], index: 2, kind: output, shape index: {0}]   ;;  %s959_s3 = inlined_call_operand.hbm [shape: f32[2,1,128], index: 3, kind: output, shape index: {1}]  }
   0x1   :  { %11 = vsyncpa [#allocation3 + $0x1], 0 }
   0x2   :  { %12 = vsyncpa [#allocation5], 0 }
   0x3   :  { %14 = vsyncpa [#allocation5 + $0x1], 0  ;;  %s761_s12 = smov 0   ;;  %s763_s13 = smov 0  }
   0x4   :  { %s765_s14 = smov 0   ;;  %s767_s15 = smov 0  }
   0x5   :  { %s769_s16 = smov 0   ;;  %s771_s17 = smov 0  }
   0x6   :  { %s773_s18 = smov 0   ;;  %s775_s19 = smov 0  }
   0x7 LB: > { %s511_s20 = sadd.s32 4294967295, %s735_s19   ;;  %s512_s21 = sadd.s32 4294967294, %s735_s19   ;;  %s735_s19 = sphi %s775_s19, %s20_s19   ;;  %s731_s18 = sphi %s773_s18, %s970_s18   ;;  %s727_s17 = sphi %s771_s17, %s969_s17   ;;  %s723_s16 = sphi %s769_s16, %s968_s16   ;;  %s719_s15 = sphi %s767_s15, %s967_s15   ;;  %s715_s14 = sphi %s765_s14, %s966_s14   ;;  %s711_s13 = sphi %s763_s13, %s965_s13   ;;  %s707_s12 = sphi %s761_s12, %s964_s12  }
   0x8   : > { %s29_s22 = sadd.s32 1, %s727_s17  ;;  %s32_s23 = sadd.s32 1, %s731_s18 }
   0x9   : > { %p30_p0 = scmp.ge.s32.totalorder %s29_s22, 2  ;;  %p105_p1 = scmp.ne.s32.totalorder %s715_s14, %s711_s13 }
   0xa   : > { %p106_p2 = scmp.eq.s32.totalorder %s511_s20, 3  ;;  %p111_p4 = scmp.ne.s32.totalorder %s711_s13, %s707_s12 }
   0xb   : > { %s972_s22 = smov (%p30_p0, %s29_s22), 0  ;;  %s974_s23 = smov (!%p30_p0, %s32_s23), %s731_s18 }
   0xc   : > { %p810_p3 = por %p106_p2, %p105_p1  ;;  %p34_p5 = scmp.ge.s32.totalorder %s974_s23, 2 }
   0xd   : > { %p112_p6 = scmp.eq.s32.totalorder %s512_s21, 3  ;;  %p515_p7 = scmp.ge.s32.totalorder %s735_s19, 1 }
   0xe   : > { %p198_p8 = scmp.lt.s32.totalorder %s735_s19, 5  ;;  %s976_s23 = smov (%p34_p5, %s974_s23), 0 }
   0xf   : > { %p820_p9 = por %p112_p6, %p111_p4  ;;  %s92_s26 = ssub.s32 %s731_s18, %s976_s23 }
  0x10   : > { %p199_p10 = pnand %p515_p7, %p198_p8  ;;  %s95_s27 = sadd.s32 1, %s715_s14 }
  0x11   : > { %p93_p11 = scmp.eq.s32.totalorder %s92_s26, 0  ;;  %s831_s29 = sand.u32 (!%p199_p10), 1, %s711_s13  }
  0x12   : > { %202 = sbr.rel (%p199_p10) target bundleno = 103 (0x67), region = 28  ;;  %s516_s30 = sshll.u32 (!%p199_p10), %s719_s15, 2 }
  0x13   : > { %s828_s28 = scalar_select %p93_p11, %s715_s14, %s95_s27  }
  0x14   : > { %p251_p12 = scmp.lt.s32.totalorder (!%p199_p10), %s723_s16, 1  ;;  %p253_p13 = scmp.lt.s32.totalorder (!%p199_p10), %s516_s30, 4 }
  0x15   : > { %s843_s26 = scalar_lea.vmem (!%p199_p10), [#allocation2], %s831_s29  ;;  %s846_s27 = scalar_lea.vmem (!%p199_p10), [#allocation4], %s831_s29 }
  0x16   : > { %p520_p0 = scmp.ne.s32.totalorder (!%p199_p10), %s719_s15, 0 }
  0x19   : > { %s252_s4 = scalar_select %p251_p12, %s723_s16, 1 }
  0x1a   : > { %s978_s30 = smov (!%p253_p13, %s516_s30), 4  ;;  %285 = sbr.rel (%p520_p0) target bundleno = 33 (0x21), region = 32 }
  0x1b   : > { %s530_s5 = smul.u32 5, %s252_s4  ;;  %v737_v0 = vmov (!%p520_p0), 0.0  }
  0x1c   : > { %286 = vst [vmem:[%s843_s26] sm:$0x1] (!%p520_p0), %v737_v0  ;;  %287 = vst [vmem:[%s846_s27] sm:$0x1] (!%p520_p0), %v737_v0 }
  0x1d   : > { %s256_s6 = sadd.s32 %s530_s5, %s978_s30 }
  0x1e   : > { %s517_s7 = sshll.u32 %s256_s6, 3 }
  0x1f   : > { %s258_s10 = scalar_lea.vmem %s956_s0, %s517_s7  ;;  %s276_s21 = scalar_lea.vmem %s957_s1, %s517_s7 }
  0x21 PF: > { %v288_v1 = vld [vmem:[%s276_s21] sm:$0xff]  ;;  %s521_s30 = sshll.u32 %s719_s15, 5  ;;  %v301_v2 = vlaneseq  ;;  %v289_v4 = vld [vmem:[%s276_s21 + $0x8] sm:$0xff]  ;;  %v290_v6 = vld [vmem:[%s276_s21 + $0x10] sm:$0xff]  ;;  %v738_v25 = vmov 0.0   ;;  %s526_s15 = sshll.u32 %s723_s16, 4 }
  0x22   : > { %v306_v3 = vstv %s521_s30  ;;  %vm292_vm0 = vcmp.ne.s32.totalorder %v288_v1, 0  ;;  %v291_v7 = vld [vmem:[%s276_s21 + $0x18] sm:$0xff]  ;;  %v296_v8 = vld [vmem:[%s258_s10] sm:$0xff]  ;;  %vm293_vm1 = vcmp.ne.s32.totalorder %v289_v4, 0  ;;  %v297_v13 = vld [vmem:[%s258_s10 + $0x8] sm:$0xff]  ;;  %vm294_vm3 = vcmp.ne.s32.totalorder %v290_v6, 0  ;;  %s871_s8 = scalar_lea.hbm %s958_s2, %s526_s15  ;;  %s878_s16 = scalar_lea.hbm %s959_s3, %s526_s15 }
  0x23   : > { %v302_v5 = vshrl.u32 %v301_v2, 7  ;;  %v298_v14 = vld [vmem:[%s258_s10 + $0x10] sm:$0xff]  ;;  %v299_v15 = vld [vmem:[%s258_s10 + $0x18] sm:$0xff]  ;;  %vm295_vm4 = vcmp.ne.s32.totalorder %v291_v7, 0  ;;  %v323_v53 = vld [vmem:[%s843_s26] sm:$0x1] }
  0x24   : > { %v343_v54 = vld [vmem:[%s846_s27] sm:$0x1]  ;;  %s380_s4 = sshll.u32 %s843_s26, 4  ;;  %s393_s5 = sshll.u32 %s846_s27, 4  ;;  %s873_s4 = int_to_ptr.vmem [resolvable:$true] %s380_s4  ;;  %s880_s5 = int_to_ptr.vmem [resolvable:$true] %s393_s5 }
  0x25   : > { %v303_v9 = vadd.s32 8, %v302_v5  ;;  %v304_v10 = vadd.s32 16, %v302_v5  ;;  %v305_v11 = vadd.s32 24, %v302_v5  ;;  %v307_v12 = vadd.s32 %v306_v3, %v302_v5  ;;  %s364_s11 = scalar_lea.sflag [#allocation3], %s831_s29  ;;  %s609_s20 = scalar_lea.vmem %s873_s4, 16 }
  0x26   : > { %p610_p1 = scmp.ne.s32.totalorder %s873_s4, %s609_s20  ;;  %s739_s21 = smov [#allocation2]  }
  0x27   : > { %v308_v16 = vadd.s32 %v306_v3, %v303_v9  ;;  %v309_v17 = vadd.s32 %v306_v3, %v304_v10  ;;  %v310_v18 = vadd.s32 %v306_v3, %v305_v11  ;;  %vm311_vm2 = vcmp.lt.s32.totalorder %v307_v12, 40  ;;  %s613_s30 = sshll.u32 %s739_s21, 4  ;;  %s614_s30 = int_to_ptr.vmem [resolvable:$false] %s613_s30 }
  0x28   : > { %vm853_vm5 = vmand %vm292_vm0, %vm311_vm2  ;;  %v319_v20 = vsel %vm311_vm2, %v296_v8, 0.0  ;;  %p611_p2 = pnand %p610_p1, %p810_p3  ;;  %s615_s6 = scalar_lea.vmem %s614_s30, 32 }
  0x29   : > { %vm312_vm6 = vcmp.lt.s32.totalorder %v308_v16, 40  ;;  %vm313_vm7 = vcmp.lt.s32.totalorder %v309_v17, 40  ;;  %vm314_vm8 = vcmp.lt.s32.totalorder %v310_v18, 40  ;;  %v324_v21 = vand.u32 2147483647, %v319_v20  ;;  %p616_p5 = scmp.lt.s32.totalorder %s873_s4, %s614_s30  ;;  %p617_p6 = scmp.lt.s32.totalorder %s615_s6, %s609_s20 }
  0x2a   : > { %vm316_vm9 = vmand %vm293_vm1, %vm312_vm6  ;;  %v320_v22 = vsel %vm312_vm6, %v297_v13, 0.0  ;;  %v321_v23 = vsel %vm313_vm7, %v298_v14, 0.0  ;;  %v322_v24 = vsel %vm314_vm8, %v299_v15, 0.0  ;;  %v522_v26 = vsel %vm853_vm5, 1.0, %v738_v25  ;;  %p612_p4 = pneg %p611_p2 }
  0x2b   : > { %vm317_vm10 = vmand %vm294_vm3, %vm313_vm7  ;;  %v325_v27 = vand.u32 2147483647, %v320_v22  ;;  %v326_v28 = vand.u32 2147483647, %v321_v23  ;;  %v327_v29 = vand.u32 2147483647, %v322_v24  ;;  %p618_p7 = por %p617_p6, %p616_p5 }
  0x2c   : > { %vm318_vm11 = vmand %vm295_vm4, %vm314_vm8  ;;  %v328_v30 = vsel %vm853_vm5, %v324_v21, 0.0  ;;  %v523_v31 = vsel %vm316_vm9, 1.0, %v738_v25  ;;  %v524_v34 = vsel %vm317_vm10, 1.0, %v738_v25 }
  0x2d   : > { %v329_v32 = vsel %vm316_vm9, %v325_v27, 0.0  ;;  %v330_v33 = vsel %vm317_vm10, %v326_v28, 0.0  ;;  %v352_v36 = vadd.f32 %v523_v31, %v522_v26  ;;  %v331_v37 = vsel %vm318_vm11, %v327_v29, 0.0  ;;  %p619_p8 = pnand %p618_p7, %p612_p4 }
  0x2e   : > { %v332_v35 = vadd.f32 %v329_v32, %v328_v30  ;;  %v525_v38 = vsel %vm318_vm11, 1.0, %v738_v25 }
  0x2f   : > { %v353_v40 = vadd.f32 %v524_v34, %v352_v36 }
  0x30   : > { %v333_v39 = vadd.f32 %v332_v35, %v330_v33 }
  0x31   : > { %v354_v42 = vadd.f32 %v525_v38, %v353_v40 }
  0x32   : > { %v334_v41 = vadd.f32 %v333_v39, %v331_v37 }
  0x33   : > { %v355_v44 = vrot.slane %v354_v42, 4 }
  0x34   : > { %v335_v43 = vrot.slane %v334_v41, 4 }
  0x35   : > { %v356_v46 = vadd.f32 %v355_v44, %v354_v42 }
  0x36   : > { %v336_v45 = vadd.f32 %v335_v43, %v334_v41 }
  0x37   : > { %v357_v48 = vrot.slane %v356_v46, 2 }
  0x38   : > { %v337_v47 = vrot.slane %v336_v45, 2 }
  0x39   : > { %v358_v50 = vadd.f32 %v357_v48, %v356_v46 }
  0x3a   : > { %v338_v49 = vadd.f32 %v337_v47, %v336_v45 }
  0x3b   : > { %v359_v52 = vrot.slane %v358_v50, 1 }
  0x3c   : > { %v339_v51 = vrot.slane %v338_v49, 1 }
  0x3d   : > { %v360_v56 = vadd.f32 %v359_v52, %v358_v50 }
  0x3e   : > { %v340_v55 = vadd.f32 %v339_v51, %v338_v49 }
  0x3f   : > { %v361_v58 = vadd.f32 %v360_v56, %v343_v54 }
  0x40   : > { %v341_v57 = vadd.f32 %v340_v55, %v323_v53 }
  0x41   : > { %362 = vst [vmem:[%s846_s27] sm:$0x1] %v361_v58 }
  0x42   : > { %342 = vst [vmem:[%s843_s26] sm:$0x1] %v341_v57 }
  0x43   : > { %622 = shalt.err (!%p619_p8)
}
  0x44   : > { %s623_s26 = scalar_lea.hbm %s871_s8, 16  ;;  %s627_s7 = scalar_lea.hbm %s958_s2, 32 }
  0x45   : > { %p624_p10 = scmp.ne.s32.totalorder %s871_s8, %s623_s26  ;;  %p628_p13 = scmp.lt.u32.totalorder %s871_s8, %s958_s2 }
  0x46   : > { %p629_p0 = scmp.lt.u32.totalorder %s627_s7, %s623_s26  ;;  %p631_p2 = scmp.lt.u32.totalorder %s623_s26, %s871_s8 }
  0x47   : > { %p625_p11 = pnand %p624_p10, %p810_p3 }
  0x48   : > { %p630_p1 = por %p629_p0, %p628_p13 }
  0x49   : > { %p626_p12 = pneg %p625_p11 }
  0x4a   : > { %p632_p4 = por %p631_p2, %p630_p1 }
  0x4c   : > { %p633_p5 = pnand %p632_p4, %p626_p12 }
  0x4e   : > { %636 = shalt.err (!%p633_p5)
}
  0x4f   : > { %531 = dma.vmem_to_hbm [thread:$0]  (%p810_p3), %s873_s4, 16, %s871_s8, %s364_s11  }
  0x50   : > { %s368_s20 = scalar_lea.sflag [#allocation5], %s831_s29  ;;  %s637_s21 = scalar_lea.vmem %s880_s5, 16 }
  0x51   : > { %p638_p6 = scmp.ne.s32.totalorder %s880_s5, %s637_s21  ;;  %s740_s30 = smov [#allocation4]  }
  0x52   : > { %s641_s6 = sshll.u32 %s740_s30, 4  ;;  %s642_s6 = int_to_ptr.vmem [resolvable:$false] %s641_s6 }
  0x53   : > { %p639_p7 = pnand %p638_p6, %p810_p3  ;;  %s643_s26 = scalar_lea.vmem %s642_s6, 32 }
  0x54   : > { %p644_p10 = scmp.lt.s32.totalorder %s880_s5, %s642_s6  ;;  %p645_p11 = scmp.lt.s32.totalorder %s643_s26, %s637_s21 }
  0x55   : > { %p640_p8 = pneg %p639_p7 }
  0x56   : > { %p646_p12 = por %p645_p11, %p644_p10 }
  0x58   : > { %p647_p13 = pnand %p646_p12, %p640_p8 }
  0x5a   : > { %650 = shalt.err (!%p647_p13)
}
  0x5b   : > { %s651_s29 = scalar_lea.hbm %s878_s16, 16  ;;  %s655_s11 = scalar_lea.hbm %s959_s3, 32 }
  0x5c   : > { %p652_p0 = scmp.ne.s32.totalorder %s878_s16, %s651_s29  ;;  %p656_p4 = scmp.lt.u32.totalorder %s878_s16, %s959_s3 }
  0x5d   : > { %p657_p5 = scmp.lt.u32.totalorder %s655_s11, %s651_s29  ;;  %p659_p7 = scmp.lt.u32.totalorder %s651_s29, %s878_s16 }
  0x5e   : > { %p653_p1 = pnand %p652_p0, %p810_p3 }
  0x5f   : > { %p658_p6 = por %p657_p5, %p656_p4 }
  0x60   : > { %p654_p2 = pneg %p653_p1 }
  0x61   : > { %p660_p8 = por %p659_p7, %p658_p6 }
  0x63   : > { %p661_p10 = pnand %p660_p8, %p654_p2 }
  0x65   : > { %664 = shalt.err (!%p661_p10)
}
  0x66   : > { %532 = dma.vmem_to_hbm [thread:$0]  (%p810_p3), %s880_s5, 16, %s878_s16, %s368_s20  }
  0x67 PF: > { %p542_p11 = scmp.ge.s32.totalorder %s735_s19, 2  ;;  %s405_s7 = sand.u32 1, %s707_s12  }
  0x68   : > { %s406_s9 = scalar_lea.sflag [#allocation3], %s405_s7 }
  0x69   : > { %p536_p12 = pnand %p542_p11, %p820_p9 }
  0x6b   : > { %698 = dma.done.wait (!%p536_p12), %s406_s9, 16  }
  0x6c   : > { %700 = vsyncadd (!%p536_p12), %s406_s9, 4294967280  ;;  %s414_s10 = scalar_lea.sflag [#allocation5], %s405_s7 }
  0x6d   : > { %702 = dma.done.wait (!%p536_p12), %s414_s10, 16  }
  0x6e   : > { %704 = vsyncadd (!%p536_p12), %s414_s10, 4294967280  ;;  %s20_s19 = sadd.s32 1, %s735_s19   ;;  %s964_s12 = smov %s711_s13 }
  0x6f   : > { %p17_p13 = scmp.ge.s32.totalorder %s20_s19, 6   ;;  %s965_s13 = smov %s715_s14 }
  0x70   : > { %s966_s14 = smov %s828_s28  ;;  %s967_s15 = smov %s727_s17 }
  0x71   : > { %s968_s16 = smov %s731_s18  ;;  %s969_s17 = smov %s972_s22 }
  0x72   : > { %s970_s18 = smov %s976_s23  ;;  %19 = sbr.rel (!%p17_p13) target bundleno = 7 (0x7), region = 87 }
  0x79   :  { %418 = vsyncpa [#allocation3], 1 }
  0x7a   :  { %420 = vsyncpa [#allocation3 + $0x1], 1 }
  0x7b   :  { %421 = vsyncpa [#allocation5], 1 }
  0x7c   :  { %423 = vsyncpa [#allocation5 + $0x1], 1 }

</bundles_post_ra>
